<compile_context>
chip_gen: v7x
topology: tpu7x:2x2x1
jax: 0.10.0
libtpu: 0.0.40
codegen_flags: <defaults>
</compile_context>

<pallas_src>
import jax
import jax.numpy as jnp
from jax.experimental import pallas as pl
from jax.experimental.pallas import tpu as pltpu


# ----------------------------- Pallas kernel --------------------------------

def _conv_down_kernel(x_ref, w_ref, b_ref, o_ref):
    """One row-tile of the 2x2 / stride-2 conv as a single K=4*C matmul.

    x_ref: (rt, 2, Wo, 2*C)  f32 patch slabs; axis 1 = kh, lane index = kw*C+c
    w_ref: (4*C, Cout)       bf16, contraction index = kh*2*C + kw*C + c
    b_ref: (1, Cout)         f32
    o_ref: (rt*Wo, Cout)     f32, lane-dense
    """
    rt, _, Wo, twoC = x_ref.shape
    m = rt * Wo
    # Ref slices are free; the (rt, Wo, 2C) -> (rt*Wo, 2C) reshape is a layout
    # no-op for f32 when Wo % 8 == 0 (true for typical even ViT grids).
    # TODO(synk): for Wo not a multiple of 8 this reshape costs a relayout
    # copy per step; pad Wo (or use a dot_general on the 3-D value) there.
    x0 = x_ref[:, 0].reshape(m, twoC)                   # kh = 0 taps (f32)
    x1 = x_ref[:, 1].reshape(m, twoC)                   # kh = 1 taps (f32)
    # Lane concat (free) -> single full-depth K = 4*C contraction; cast to
    # bf16 so the MXU gets native inputs, accumulate in f32.
    x01 = jnp.concatenate([x0, x1], axis=-1).astype(w_ref.dtype)
    acc = jnp.dot(x01, w_ref[...], preferred_element_type=jnp.float32)
    acc += b_ref[...].astype(jnp.float32)
    o_ref[...] = acc.astype(o_ref.dtype)


def _pick_row_tile(rows, Wo, C, Cout, itemsize=4, budget_bytes=12 << 20):
    """Largest divisor of `rows` whose double-buffered tiles fit the budget."""
    per_row = 2 * (Wo * 4 * C * itemsize + Wo * Cout * itemsize)  # in + out, x2 buf
    cap = max(1, budget_bytes // per_row)
    best = 1
    for d in range(1, min(rows, cap) + 1):
        if rows % d == 0:
            best = d
    return best


def conv_downsample_pallas(x, w_flat, b, *, row_tile=None):
    """Conv2d(dim, next_dim, kernel=2, stride=2, padding=0) on NHWC input.

    x:      (B, H, W, C)    channels-last activations (f32)
    w_flat: (4*C, Cout)     bf16 weight slab, index = kh*2*C + kw*C + c
                            (PyTorch OIHW weight.transpose(2,3,1,0).reshape(4C, Cout))
    b:      (Cout,)         f32 bias
    returns (B, H//2, W//2, Cout)
    """
    B, H, W, C = x.shape
    K, Cout = w_flat.shape
    assert K == 4 * C, (K, C)
    Ho, Wo = H // 2, W // 2
    # k=2, s=2, p=0 drops a trailing row/col when H or W is odd (matches torch).
    if H != 2 * Ho or W != 2 * Wo:
        x = x[:, : 2 * Ho, : 2 * Wo, :]

    rows = B * Ho
    if row_tile is None:
        row_tile = _pick_row_tile(rows, Wo, C, Cout, x.dtype.itemsize)
    if rows % row_tile:
        raise ValueError(f"row_tile={row_tile} must divide B*Ho={rows}")

    # Pure-view reshapes (no data movement).
    xr = x.reshape(rows, 2, Wo, 2 * C)
    b2 = b.reshape(1, Cout)

    out = pl.pallas_call(
        _conv_down_kernel,
        out_shape=jax.ShapeDtypeStruct((rows * Wo, Cout), x.dtype),
        grid=(rows // row_tile,),
        in_specs=[
            pl.BlockSpec((row_tile, 2, Wo, 2 * C), lambda i: (i, 0, 0, 0)),
            pl.BlockSpec((4 * C, Cout), lambda i: (0, 0)),
            pl.BlockSpec((1, Cout), lambda i: (0, 0)),
        ],
        out_specs=pl.BlockSpec((row_tile * Wo, Cout), lambda i: (i, 0)),
        compiler_params=pltpu.CompilerParams(
            dimension_semantics=("parallel",),
            vmem_limit_bytes=32 * 1024 * 1024,
        ),
    )(xr, w_flat, b2)
    return out.reshape(B, Ho, Wo, Cout)


# --------------------------- module equivalent -------------------------------

class ConvDownsamplePallas:
    """Pallas port of ConvDownsample: nn.Conv2d(dim, next_dim, 2, stride=2)."""

    def __init__(self, dim, next_dim, key=None):
        if key is None:
            key = jax.random.PRNGKey(0)
        k_w, k_b = jax.random.split(key)
        fan_in = dim * 4
        bound = 1.0 / (fan_in ** 0.5)
        # HWIO init, then flatten (kh, kw, c) -> contraction axis and store in
        # bf16 so the kernel feeds the MXU native bf16 inputs.  A PyTorch OIHW
        # weight maps via w_oihw.transpose(2, 3, 1, 0).reshape(4*dim, next_dim).
        w_hwio = jax.random.uniform(
            k_w, (2, 2, dim, next_dim), jnp.float32, -bound, bound)
        self.w = w_hwio.reshape(4 * dim, next_dim).astype(jnp.bfloat16)
        self.b = jax.random.uniform(k_b, (next_dim,), jnp.float32, -bound, bound)
        self.dim, self.next_dim = dim, next_dim

    def __call__(self, x):
        assert x.ndim == 4 and x.shape[-1] == self.dim
        return conv_downsample_pallas(x, self.w, self.b)


# ---------------------------------- main -------------------------------------

if __name__ == "__main__":
    key = jax.random.PRNGKey(0)
    kx, kp = jax.random.split(key)
    # dim=64 -> next_dim=128 (typical ViT stage transition): contraction depth
    # 4*C = 256 and output lane width 128 both hit full MXU / vreg tiles.
    B, H, W, Cin, Cout = 2, 16, 16, 64, 128
    x = jax.random.normal(kx, (B, H, W, Cin), dtype=jnp.float32)

    mod = ConvDownsamplePallas(Cin, Cout, key=kp)
    y = mod(x)
    jax.block_until_ready(y)

    # Independent im2col reference at highest precision (same bf16-stored
    # weights, f32 math), so the only kernel-side error is the in-kernel
    # activation cast to bf16 with f32 accumulation.
    Ho, Wo = H // 2, W // 2
    patches = x.reshape(B, Ho, 2, Wo, 2, Cin).transpose(0, 1, 3, 2, 4, 5)
    patches = patches.reshape(B, Ho, Wo, 4 * Cin)
    w_f32 = mod.w.astype(jnp.float32)
    y_ref = jnp.einsum(
        "bhwk,ko->bhwo", patches, w_f32,
        precision=jax.lax.Precision.HIGHEST) + mod.b

    assert y.shape == (B, Ho, Wo, Cout) and y.dtype == jnp.float32
    assert bool(jnp.all(jnp.isfinite(y)))
    max_err = float(jnp.max(jnp.abs(y - y_ref)))
    assert max_err < 2e-2, f"mismatch vs reference: max abs err {max_err}"
    print("KERNEL_OK")
</pallas_src>

<mosaic_0001>
module attributes {stable_mosaic.version = 11 : i64} {
  func.func @_conv_down_kernel(%arg0: i32, %arg1: memref<16x2x8x128xf32, #tpu.memory_space<vmem>>, %arg2: memref<256x128xbf16, #tpu.memory_space<vmem>>, %arg3: memref<1x128xf32, #tpu.memory_space<vmem>>, %arg4: memref<128x128xf32, #tpu.memory_space<vmem>>) attributes {dimension_semantics = [#tpu.dimension_semantics<parallel>], iteration_bounds = array<i64: 1>, scalar_prefetch = 0 : i64, scratch_operands = 0 : i64, tpu.core_type = #tpu.core_type<tc>, window_params = [{transform_indices = @transform_0, window_bounds = array<i64: 16, 2, 8, 128>}, {pipeline_mode = #tpu.pipeline_mode<synchronous>, transform_indices = @transform_1, window_bounds = array<i64: 256, 128>}, {pipeline_mode = #tpu.pipeline_mode<synchronous>, transform_indices = @transform_2, window_bounds = array<i64: 1, 128>}, {transform_indices = @transform_3, window_bounds = array<i64: 128, 128>}]} {
    %c0 = arith.constant 0 : index
    %c0_0 = arith.constant 0 : index
    %c0_1 = arith.constant 0 : index
    %c0_2 = arith.constant 0 : index
    %0 = vector.load %arg1[%c0, %c0_0, %c0_1, %c0_2] : memref<16x2x8x128xf32, #tpu.memory_space<vmem>>, vector<16x1x8x128xf32>
    %1 = vector.shape_cast %0 : vector<16x1x8x128xf32> to vector<16x8x128xf32>
    %2 = vector.shape_cast %1 : vector<16x8x128xf32> to vector<128x128xf32>
    %c0_3 = arith.constant 0 : index
    %c1 = arith.constant 1 : index
    %c0_4 = arith.constant 0 : index
    %c0_5 = arith.constant 0 : index
    %3 = vector.load %arg1[%c0_3, %c1, %c0_4, %c0_5] : memref<16x2x8x128xf32, #tpu.memory_space<vmem>>, vector<16x1x8x128xf32>
    %4 = vector.shape_cast %3 : vector<16x1x8x128xf32> to vector<16x8x128xf32>
    %5 = vector.shape_cast %4 : vector<16x8x128xf32> to vector<128x128xf32>
    %6 = tpu.concatenate %2, %5 in 1 : vector<128x128xf32>, vector<128x128xf32> -> vector<128x256xf32>
    %7 = arith.truncf %6 : vector<128x256xf32> to vector<128x256xbf16>
    %c0_6 = arith.constant 0 : index
    %c0_7 = arith.constant 0 : index
    %8 = vector.load %arg2[%c0_6, %c0_7] : memref<256x128xbf16, #tpu.memory_space<vmem>>, vector<256x128xbf16>
    %cst = arith.constant dense<0.000000e+00> : vector<128x128xf32>
    %9 = tpu.matmul %7, %8, %cst {dimension_numbers = #tpu.dot_dimension_numbers<[1], [0], [0], [1], [0, 0, 1, 1], [], []>} : vector<128x256xbf16>, vector<256x128xbf16>, vector<128x128xf32> -> vector<128x128xf32>
    %c0_8 = arith.constant 0 : index
    %c0_9 = arith.constant 0 : index
    %10 = vector.load %arg3[%c0_8, %c0_9] : memref<1x128xf32, #tpu.memory_space<vmem>>, vector<1x128xf32>
    %11 = vector.broadcast %10 : vector<1x128xf32> to vector<128x128xf32>
    %12 = arith.addf %9, %11 : vector<128x128xf32>
    %c0_10 = arith.constant 0 : index
    %c0_11 = arith.constant 0 : index
    %13 = vector.load %arg4[%c0_10, %c0_11] : memref<128x128xf32, #tpu.memory_space<vmem>>, vector<128x128xf32>
    tpu.vector_store %arg4[%c0_10, %c0_11], %12 {strides = array<i32>} : memref<128x128xf32, #tpu.memory_space<vmem>>, vector<128x128xf32>,
    return
  }
  func.func @transform_0(%arg0: i32) -> (i32, i32, i32, i32) {
    %c0_i32 = arith.constant 0 : i32
    %c0_i32_0 = arith.constant 0 : i32
    %c0_i32_1 = arith.constant 0 : i32
    %c0_i32_2 = arith.constant 0 : i32
    return %arg0, %c0_i32, %c0_i32_0, %c0_i32_1 : i32, i32, i32, i32
  }
  func.func @transform_1(%arg0: i32) -> (i32, i32) {
    %c0_i32 = arith.constant 0 : i32
    %c0_i32_0 = arith.constant 0 : i32
    %c0_i32_1 = arith.constant 0 : i32
    return %c0_i32, %c0_i32_0 : i32, i32
  }
  func.func @transform_2(%arg0: i32) -> (i32, i32) {
    %c0_i32 = arith.constant 0 : i32
    %c0_i32_0 = arith.constant 0 : i32
    %c0_i32_1 = arith.constant 0 : i32
    return %c0_i32, %c0_i32_0 : i32, i32
  }
  func.func @transform_3(%arg0: i32) -> (i32, i32) {
    %c0_i32 = arith.constant 0 : i32
    %c0_i32_0 = arith.constant 0 : i32
    return %arg0, %c0_i32 : i32, i32
  }
}

</mosaic_0001>

<bundles_post_ra>
// kernel: tpu_custom_call.1
= control target key start
LH: loop header
LB: loop body
LE: loop exit
PB: predicated region body
PF: predicated region fallthrough
CT: control target
= control target key end

     0   :  { %8 = vsyncpa [#allocation3], 0  ;;  %s641_s0 = inlined_call_operand.hbm [shape: f32[16,2,8,128], index: 0, kind: input, shape index: {}]   ;;  %s642_s1 = inlined_call_operand.hbm [shape: bf16[256,128], index: 1, kind: input, shape index: {}]   ;;  %s643_s2 = inlined_call_operand.vmem [shape: f32[1,128], index: 2, kind: input, shape index: {}]   ;;  %s644_s3 = inlined_call_operand.hbm [shape: f32[128,128], index: 3, kind: output, shape index: {}]  }
   0x1   :  { %9 = vsyncpa [#allocation6], 0 }
   0x2   :  { %10 = vsyncpa [#allocation4], 0  ;;  %s551_s12 = smov [#allocation2]   ;;  %s479_s16 = scalar_lea.hbm %s641_s0, 4096 }
   0x3   :  { %s16_s13 = sshll.u32 %s551_s12, 4  ;;  %p480_p0 = scmp.ne.s32.totalorder %s641_s0, %s479_s16  ;;  %s17_s13 = int_to_ptr.vmem [resolvable:$true] %s16_s13 }
   0x4   :  { %p483_p1 = scmp.lt.u32.totalorder %s479_s16, %s641_s0 }
   0x6   :  { %p485_p2 = pnand %p483_p1, %p480_p0 }
   0x8   :  { %488 = shalt.err (!%p485_p2)
}
   0x9   :  { %s489_s21 = scalar_lea.vmem %s17_s13, 4096  ;;  %p494_p4 = scmp.lt.s32.totalorder %s17_s13, %s17_s13 }
   0xa   :  { %p490_p3 = scmp.ne.s32.totalorder %s17_s13, %s489_s21  ;;  %p495_p5 = scmp.lt.s32.totalorder %s489_s21, %s489_s21 }
   0xc   :  { %p496_p6 = por %p495_p5, %p494_p4 }
   0xe   :  { %p497_p7 = pnand %p496_p6, %p490_p3 }
  0x10   :  { %500 = shalt.err (!%p497_p7)
}
  0x11   :  { %s552_s22 = smov 128   ;;  %s553_s23 = smov 8  }
  0x12   :  { %22 = dma.hbm_to_vmem [thread:$0]  %s641_s0, 4096, %s17_s13, [#allocation3], %s552_s22, %s552_s22, %s553_s23  }
  0x13   :  { %s554_s26 = smov [#allocation5]   ;;  %s501_s30 = scalar_lea.hbm %s642_s1, 2048 }
  0x14   :  { %s28_s27 = sshll.u32 %s554_s26, 4  ;;  %p502_p8 = scmp.ne.s32.totalorder %s642_s1, %s501_s30  ;;  %s29_s27 = int_to_ptr.vmem [resolvable:$true] %s28_s27 }
  0x15   :  { %p505_p9 = scmp.lt.u32.totalorder %s501_s30, %s642_s1 }
  0x17   :  { %p507_p10 = pnand %p505_p9, %p502_p8 }
  0x19   :  { %510 = shalt.err (!%p507_p10)
}
  0x1a   :  { %s511_s8 = scalar_lea.vmem %s29_s27, 2048  ;;  %p516_p12 = scmp.lt.s32.totalorder %s29_s27, %s29_s27 }
  0x1b   :  { %p512_p11 = scmp.ne.s32.totalorder %s29_s27, %s511_s8  ;;  %p517_p13 = scmp.lt.s32.totalorder %s511_s8, %s511_s8 }
  0x1d   :  { %p518_p0 = por %p517_p13, %p516_p12 }
  0x1f   :  { %p519_p1 = pnand %p518_p0, %p512_p11 }
  0x21   :  { %522 = shalt.err (!%p519_p1)
}
  0x22   :  { %s555_s0 = smov 64   ;;  %s556_s9 = smov 4  }
  0x23   :  { %34 = dma.hbm_to_vmem [thread:$0]  %s642_s1, 2048, %s29_s27, [#allocation6], %s555_s0, %s555_s0, %s556_s9  }
  0x24   :  { %545 = dma.done.wait [#allocation3], 4096  }
  0x25   :  { %546 = vsyncadd [#allocation3], 4294963200 }
  0x26   :  { %547 = dma.done.wait [#allocation6], 2048  }
  0x27   :  { %548 = vsyncadd [#allocation6], 4294965248  ;;  %v463_v0 = vld [vmem:[#allocation5 + $0x40] sm:$0xff]   ;;  %v465_v2 = vld [vmem:[#allocation5 + $0x48] sm:$0xff]  }
  0x28   :  { %v464_v1 = vld [vmem:[#allocation5] sm:$0xff]   ;;  %376 = vmatprep.subr.bf16.mxu0 %v463_v0  ;;  %440 = vmatprep.subr.bf16.mxu1 %v463_v0  ;;  %v466_v3 = vld [vmem:[#allocation5 + $0x8] sm:$0xff]   ;;  %v467_v4 = vld [vmem:[#allocation5 + $0x50] sm:$0xff]  }
  0x29   :  { %377 = vmatpush3.bf16.msra.mxu0 %v464_v1  ;;  %448 = vmatpush3.bf16.msra.mxu1 %v464_v1  ;;  %v468_v5 = vld [vmem:[#allocation5 + $0x10] sm:$0xff]   ;;  %v469_v6 = vld [vmem:[#allocation5 + $0x58] sm:$0xff]   ;;  %v471_v8 = vld [vmem:[#allocation5 + $0x60] sm:$0xff]  }
  0x2a   :  { %378 = vmatprep.subr.bf16.mxu0 %v465_v2  ;;  %441 = vmatprep.subr.bf16.mxu1 %v465_v2  ;;  %v470_v7 = vld [vmem:[#allocation5 + $0x18] sm:$0xff]   ;;  %v472_v9 = vld [vmem:[#allocation5 + $0x20] sm:$0xff]   ;;  %v473_v10 = vld [vmem:[#allocation5 + $0x68] sm:$0xff]  }
  0x2b   :  { %v61_v11 = vld [vmem:[#allocation2 + $0x8] sm:$0xff]  ;;  %v62_v12 = vld [vmem:[#allocation2 + $0x18] sm:$0xff]  ;;  %v475_v18 = vld [vmem:[#allocation5 + $0x70] sm:$0xff]  }
  0x2c   :  { %v69_v13 = vld [vmem:[#allocation2 + $0x88] sm:$0xff]  ;;  %v78_v14 = vpack.c.bf16 %v62_v12, %v61_v11  ;;  %v70_v15 = vld [vmem:[#allocation2 + $0x98] sm:$0xff]  ;;  %v476_v19 = vld [vmem:[#allocation5 + $0x30] sm:$0xff]  }
  0x2d   :  { %379 = vmatpush3.bf16.msra.mxu0 %v466_v3  ;;  %449 = vmatpush3.bf16.msra.mxu1 %v466_v3  ;;  %v86_v16 = vpack.c.bf16 %v70_v15, %v69_v13  ;;  %v474_v17 = vld [vmem:[#allocation5 + $0x28] sm:$0xff]   ;;  %v477_v20 = vld [vmem:[#allocation5 + $0x78] sm:$0xff]   ;;  %v44_v22 = vld [vmem:[#allocation2] sm:$0xff] }
  0x2e   :  { %380 = vmatprep.subr.bf16.mxu0 %v467_v4  ;;  %442 = vmatprep.subr.bf16.mxu1 %v467_v4  ;;  %v478_v21 = vld [vmem:[#allocation5 + $0x38] sm:$0xff]   ;;  %v45_v23 = vld [vmem:[#allocation2 + $0x10] sm:$0xff]  ;;  %v52_v24 = vld [vmem:[#allocation2 + $0x80] sm:$0xff] }
  0x2f   :  { %260 = vmatprep.mubr.bf16.mxu0 %v78_v14  ;;  %292 = vmatprep.mubr.bf16.mxu1 %v86_v16  ;;  %v53_v25 = vld [vmem:[#allocation2 + $0x90] sm:$0xff]  ;;  %v63_v26 = vld [vmem:[#allocation2 + $0x28] sm:$0xff]  ;;  %v64_v27 = vld [vmem:[#allocation2 + $0x38] sm:$0xff]  ;;  %v77_v30 = vpack.c.bf16 %v45_v23, %v44_v22 }
  0x30   :  { %v71_v28 = vld [vmem:[#allocation2 + $0xa8] sm:$0xff]  ;;  %v72_v29 = vld [vmem:[#allocation2 + $0xb8] sm:$0xff]  ;;  %v85_v31 = vpack.c.bf16 %v53_v25, %v52_v24  ;;  %v80_v32 = vpack.c.bf16 %v64_v27, %v63_v26  ;;  %v46_v34 = vld [vmem:[#allocation2 + $0x20] sm:$0xff] }
  0x31   :  { %381 = vmatpush3.bf16.msra.mxu0 %v468_v5  ;;  %450 = vmatpush3.bf16.msra.mxu1 %v468_v5  ;;  %v88_v33 = vpack.c.bf16 %v72_v29, %v71_v28  ;;  %v47_v35 = vld [vmem:[#allocation2 + $0x30] sm:$0xff]  ;;  %v54_v36 = vld [vmem:[#allocation2 + $0xa0] sm:$0xff]  ;;  %v65_v38 = vld [vmem:[#allocation2 + $0x48] sm:$0xff] }
  0x32   :  { %382 = vmatprep.subr.bf16.mxu0 %v469_v6  ;;  %443 = vmatprep.subr.bf16.mxu1 %v469_v6  ;;  %v55_v37 = vld [vmem:[#allocation2 + $0xb0] sm:$0xff]  ;;  %v66_v39 = vld [vmem:[#allocation2 + $0x58] sm:$0xff]  ;;  %v73_v40 = vld [vmem:[#allocation2 + $0xc8] sm:$0xff]  ;;  %v79_v42 = vpack.c.bf16 %v47_v35, %v46_v34 }
  0x33   :  { %v74_v41 = vld [vmem:[#allocation2 + $0xd8] sm:$0xff]  ;;  %v87_v43 = vpack.c.bf16 %v55_v37, %v54_v36  ;;  %v82_v44 = vpack.c.bf16 %v66_v39, %v65_v38  ;;  %v48_v46 = vld [vmem:[#allocation2 + $0x40] sm:$0xff]  ;;  %v49_v47 = vld [vmem:[#allocation2 + $0x50] sm:$0xff] }
  0x34   :  { %v90_v45 = vpack.c.bf16 %v74_v41, %v73_v40  ;;  %v56_v48 = vld [vmem:[#allocation2 + $0xc0] sm:$0xff]  ;;  %v57_v49 = vld [vmem:[#allocation2 + $0xd0] sm:$0xff]  ;;  %v67_v50 = vld [vmem:[#allocation2 + $0x68] sm:$0xff]  ;;  %v81_v54 = vpack.c.bf16 %v49_v47, %v48_v46 }
  0x35   :  { %383 = vmatpush3.bf16.msra.mxu0 %v470_v7  ;;  %451 = vmatpush3.bf16.msra.mxu1 %v470_v7  ;;  %v68_v51 = vld [vmem:[#allocation2 + $0x78] sm:$0xff]  ;;  %v75_v52 = vld [vmem:[#allocation2 + $0xe8] sm:$0xff]  ;;  %v89_v55 = vpack.c.bf16 %v57_v49, %v56_v48  ;;  %v50_v58 = vld [vmem:[#allocation2 + $0x60] sm:$0xff] }
  0x36   :  { %384 = vmatprep.subr.bf16.mxu0 %v471_v8  ;;  %444 = vmatprep.subr.bf16.mxu1 %v471_v8  ;;  %v76_v53 = vld [vmem:[#allocation2 + $0xf8] sm:$0xff]  ;;  %v84_v56 = vpack.c.bf16 %v68_v51, %v67_v50  ;;  %v51_v59 = vld [vmem:[#allocation2 + $0x70] sm:$0xff]  ;;  %v58_v60 = vld [vmem:[#allocation2 + $0xe0] sm:$0xff] }
  0x37   :  { %v92_v57 = vpack.c.bf16 %v76_v53, %v75_v52  ;;  %v59_v61 = vld [vmem:[#allocation2 + $0xf0] sm:$0xff]  ;;  %v83_v62 = vpack.c.bf16 %v51_v59, %v50_v58  ;;  %v608_v2 = vld [vmem:[%s643_s2] ss:$0 sm:$0xff]  ;;  %s557_s2 = smov [#allocation7]  }
  0x38   :  { %v91_v63 = vpack.c.bf16 %v59_v61, %v58_v60  ;;  %s346_s13 = sshll.u32 %s557_s2, 4  ;;  %s347_s13 = int_to_ptr.vmem [resolvable:$true] %s346_s13 }
  0x39   :  { %385 = vmatpush3.bf16.msra.mxu0 %v472_v9  ;;  %452 = vmatpush3.bf16.msra.mxu1 %v472_v9  ;;  %s523_s14 = scalar_lea.vmem %s347_s13, 2048  ;;  %p528_p3 = scmp.lt.s32.totalorder %s347_s13, %s347_s13 }
  0x3a   :  { %386 = vmatprep.subr.bf16.mxu0 %v473_v10  ;;  %445 = vmatprep.subr.bf16.mxu1 %v473_v10  ;;  %p524_p2 = scmp.ne.s32.totalorder %s347_s13, %s523_s14  ;;  %p529_p4 = scmp.lt.s32.totalorder %s523_s14, %s523_s14 }
  0x3c   :  { %p530_p5 = por %p529_p4, %p528_p3 }
  0x3d   :  { %387 = vmatpush3.bf16.msra.mxu0 %v474_v17  ;;  %453 = vmatpush3.bf16.msra.mxu1 %v474_v17 }
  0x3e   :  { %388 = vmatprep.subr.bf16.mxu0 %v475_v18  ;;  %446 = vmatprep.subr.bf16.mxu1 %v475_v18  ;;  %p531_p6 = pnand %p530_p5, %p524_p2 }
  0x41   :  { %389 = vmatpush3.bf16.msra.mxu0 %v476_v19  ;;  %454 = vmatpush3.bf16.msra.mxu1 %v476_v19 }
  0x42   :  { %390 = vmatprep.subr.bf16.mxu0 %v477_v20  ;;  %447 = vmatprep.subr.bf16.mxu1 %v477_v20 }
  0x45   :  { %391 = vmatpush3.bf16.msra.mxu0 %v478_v21  ;;  %455 = vmatpush3.bf16.msra.mxu1 %v478_v21 }
  0x48   :  { %261 = vmatmul.mubr.bf16.vlgmr.msra.gmra.mrb[0].mxu0 %v77_v30  ;;  %293 = vmatmul.mubr.bf16.vlgmr.msra.gmra.mrb[0].mxu1 %v85_v31 }
  0x49   :  { %268 = vmatprep.mubr.bf16.mxu0 %v80_v32  ;;  %300 = vmatprep.mubr.bf16.mxu1 %v88_v33 }
  0x50   :  { %269 = vmatmul.mubr.bf16.gmra.mrb[4].mxu0 %v79_v42  ;;  %301 = vmatmul.mubr.bf16.gmra.mrb[4].mxu1 %v87_v43 }
  0x51   :  { %276 = vmatprep.mubr.bf16.mxu0 %v82_v44  ;;  %308 = vmatprep.mubr.bf16.mxu1 %v90_v45 }
  0x58   :  { %277 = vmatmul.mubr.bf16.gmra.mrb[8].mxu0 %v81_v54  ;;  %309 = vmatmul.mubr.bf16.gmra.mrb[8].mxu1 %v89_v55 }
  0x59   :  { %284 = vmatprep.mubr.bf16.mxu0 %v84_v56  ;;  %316 = vmatprep.mubr.bf16.mxu1 %v92_v57 }
  0x60   :  { %285 = vmatmul.mubr.bf16.gmra.mrb[12].mxu0 %v83_v62  ;;  %317 = vmatmul.mubr.bf16.gmra.mrb[12].mxu1 %v91_v63 }
 0x11b   :  { %v392_v0 = vpop.f32.mrb[0].mxu0  ;;  %v416_v1 = vpop.f32.mrb[0].mxu1 }
 0x11c   :  { %v393_v3 = vpop.f32.mrb[1].mxu0  ;;  %v417_v4 = vpop.f32.mrb[1].mxu1 }
 0x11d   :  { %v394_v5 = vadd.f32 %v393_v3, %v392_v0  ;;  %v418_v6 = vadd.f32 %v417_v4, %v416_v1  ;;  %v395_v7 = vpop.f32.mrb[2].mxu0  ;;  %v419_v8 = vpop.f32.mrb[2].mxu1 }
 0x11e   :  { %v396_v9 = vpop.f32.mrb[3].mxu0  ;;  %v420_v10 = vpop.f32.mrb[3].mxu1 }
 0x11f   :  { %v263_v11 = vadd.f32 %v394_v5, %v608_v2  ;;  %v295_v12 = vadd.f32 %v418_v6, %v608_v2  ;;  %v397_v13 = vadd.f32 %v396_v9, %v395_v7  ;;  %v421_v14 = vadd.f32 %v420_v10, %v419_v8 }
 0x121   :  { %325 = vst [vmem:[#allocation7] sm:$0xff] %v263_v11  ;;  %333 = vst [vmem:[#allocation7 + $0x40] sm:$0xff] %v295_v12  ;;  %v266_v15 = vadd.f32 %v397_v13, %v608_v2  ;;  %v298_v16 = vadd.f32 %v421_v14, %v608_v2 }
 0x123   :  { %326 = vst [vmem:[#allocation7 + $0x8] sm:$0xff] %v266_v15  ;;  %334 = vst [vmem:[#allocation7 + $0x48] sm:$0xff] %v298_v16  ;;  %v398_v17 = vpop.f32.mrb[4].mxu0  ;;  %v422_v18 = vpop.f32.mrb[4].mxu1 }
 0x124   :  { %v399_v19 = vpop.f32.mrb[5].mxu0  ;;  %v423_v20 = vpop.f32.mrb[5].mxu1 }
 0x125   :  { %v400_v21 = vadd.f32 %v399_v19, %v398_v17  ;;  %v424_v22 = vadd.f32 %v423_v20, %v422_v18  ;;  %v401_v23 = vpop.f32.mrb[6].mxu0  ;;  %v425_v24 = vpop.f32.mrb[6].mxu1 }
 0x126   :  { %v402_v25 = vpop.f32.mrb[7].mxu0  ;;  %v426_v26 = vpop.f32.mrb[7].mxu1 }
 0x127   :  { %v271_v27 = vadd.f32 %v400_v21, %v608_v2  ;;  %v303_v28 = vadd.f32 %v424_v22, %v608_v2  ;;  %v403_v29 = vadd.f32 %v402_v25, %v401_v23  ;;  %v427_v30 = vadd.f32 %v426_v26, %v425_v24 }
 0x129   :  { %327 = vst [vmem:[#allocation7 + $0x10] sm:$0xff] %v271_v27  ;;  %335 = vst [vmem:[#allocation7 + $0x50] sm:$0xff] %v303_v28  ;;  %v274_v31 = vadd.f32 %v403_v29, %v608_v2  ;;  %v306_v32 = vadd.f32 %v427_v30, %v608_v2 }
 0x12b   :  { %328 = vst [vmem:[#allocation7 + $0x18] sm:$0xff] %v274_v31  ;;  %336 = vst [vmem:[#allocation7 + $0x58] sm:$0xff] %v306_v32  ;;  %v404_v33 = vpop.f32.mrb[8].mxu0  ;;  %v428_v34 = vpop.f32.mrb[8].mxu1 }
 0x12c   :  { %v405_v35 = vpop.f32.mrb[9].mxu0  ;;  %v429_v36 = vpop.f32.mrb[9].mxu1 }
 0x12d   :  { %v406_v37 = vadd.f32 %v405_v35, %v404_v33  ;;  %v430_v38 = vadd.f32 %v429_v36, %v428_v34  ;;  %v407_v39 = vpop.f32.mrb[10].mxu0  ;;  %v431_v40 = vpop.f32.mrb[10].mxu1 }
 0x12e   :  { %v408_v41 = vpop.f32.mrb[11].mxu0  ;;  %v432_v42 = vpop.f32.mrb[11].mxu1 }
 0x12f   :  { %v279_v43 = vadd.f32 %v406_v37, %v608_v2  ;;  %v311_v44 = vadd.f32 %v430_v38, %v608_v2  ;;  %v409_v45 = vadd.f32 %v408_v41, %v407_v39  ;;  %v433_v46 = vadd.f32 %v432_v42, %v431_v40 }
 0x131   :  { %329 = vst [vmem:[#allocation7 + $0x20] sm:$0xff] %v279_v43  ;;  %337 = vst [vmem:[#allocation7 + $0x60] sm:$0xff] %v311_v44  ;;  %v282_v47 = vadd.f32 %v409_v45, %v608_v2  ;;  %v314_v48 = vadd.f32 %v433_v46, %v608_v2 }
 0x133   :  { %330 = vst [vmem:[#allocation7 + $0x28] sm:$0xff] %v282_v47  ;;  %338 = vst [vmem:[#allocation7 + $0x68] sm:$0xff] %v314_v48  ;;  %v410_v49 = vpop.f32.mrb[12].mxu0  ;;  %v434_v50 = vpop.f32.mrb[12].mxu1 }
 0x134   :  { %v411_v51 = vpop.f32.mrb[13].mxu0  ;;  %v435_v52 = vpop.f32.mrb[13].mxu1 }
 0x135   :  { %v412_v53 = vadd.f32 %v411_v51, %v410_v49  ;;  %v436_v54 = vadd.f32 %v435_v52, %v434_v50  ;;  %v413_v55 = vpop.f32.mrb[14].mxu0  ;;  %v437_v56 = vpop.f32.mrb[14].mxu1 }
 0x136   :  { %v414_v57 = vpop.f32.mrb[15].mxu0  ;;  %v438_v58 = vpop.f32.mrb[15].mxu1 }
 0x137   :  { %v287_v59 = vadd.f32 %v412_v53, %v608_v2  ;;  %v319_v60 = vadd.f32 %v436_v54, %v608_v2  ;;  %v415_v61 = vadd.f32 %v414_v57, %v413_v55  ;;  %v439_v62 = vadd.f32 %v438_v58, %v437_v56 }
 0x139   :  { %331 = vst [vmem:[#allocation7 + $0x30] sm:$0xff] %v287_v59  ;;  %339 = vst [vmem:[#allocation7 + $0x70] sm:$0xff] %v319_v60  ;;  %v290_v63 = vadd.f32 %v415_v61, %v608_v2  ;;  %v322_v0 = vadd.f32 %v439_v62, %v608_v2 }
 0x13b   :  { %332 = vst [vmem:[#allocation7 + $0x38] sm:$0xff] %v290_v63  ;;  %340 = vst [vmem:[#allocation7 + $0x78] sm:$0xff] %v322_v0 }
 0x13c   :  { %534 = shalt.err (!%p531_p6)
}
 0x13d   :  { %s535_s17 = scalar_lea.hbm %s644_s3, 2048 }
 0x13e   :  { %p536_p7 = scmp.ne.s32.totalorder %s644_s3, %s535_s17  ;;  %p539_p8 = scmp.lt.u32.totalorder %s535_s17, %s644_s3 }
 0x140   :  { %p541_p9 = pnand %p539_p8, %p536_p7 }
 0x142   :  { %544 = shalt.err (!%p541_p9)
}
 0x143   :  { %352 = dma.vmem_to_hbm [thread:$0]  %s347_s13, 2048, %s644_s3, [#allocation4], %s552_s22, %s552_s22, %s553_s23  }
 0x144   :  { %549 = dma.done.wait [#allocation4], 2048  }
 0x145   :  { %550 = vsyncadd [#allocation4], 4294965248 }
 0x146   :  { %356 = vsyncpa [#allocation3], 1 }
 0x147   :  { %357 = vsyncpa [#allocation6], 1 }
 0x148   :  { %358 = vsyncpa [#allocation4], 1 }

</bundles_post_ra>
